<compile_context>
chip_gen: v5e
topology: v5e:2x2
jax: 0.10.0
libtpu: 0.0.40
codegen_flags: <defaults>
</compile_context>

<pallas_src>
import jax
import jax.numpy as jnp
from jax.experimental import pallas as pl
from jax.experimental.pallas import tpu as pltpu

KERNEL_SIZES = (2, 3, 4, 5)
CHANNEL_OUT = 10
N_FUSED = sum(KERNEL_SIZES) * CHANNEL_OUT      # 140 fused conv-tap columns
N_FEAT = len(KERNEL_SIZES) * CHANNEL_OUT       # 40 pooled features


def cnnreg_kernel(embed_ref, w_all_ref, bias_all_ref,
                  lin1_w_ref, lin1_b_ref, lin2_w_ref, lin2_b_ref,
                  out_ref):
    embed = embed_ref[...]                                   # (TB, S, E) bf16
    TB, S, _ = embed.shape

    # Single fused MXU matmul: every conv tap of every kernel size as one
    # lane-dense (E, 140) RHS; f32 accumulation.
    y = jnp.einsum('bse,ec->bsc', embed, w_all_ref[...],
                   preferred_element_type=jnp.float32)       # (TB, S, 140) f32

    pooled = []
    off = 0
    for k in KERNEL_SIZES:
        L = S - k + 1
        # Init from tap 0 (no zeros+add), then k-1 shifted 10-wide adds.
        acc = y[:, 0:L, off:off + CHANNEL_OUT]
        for i in range(1, k):
            c0 = off + i * CHANNEL_OUT
            acc = acc + y[:, i:i + L, c0:c0 + CHANNEL_OUT]
        # max_pool1d over the full time axis; bias + ReLU are monotone so
        # they are applied after pooling (on (TB, C) instead of (TB, L, C)).
        pooled.append(jnp.max(acc, axis=1))                  # (TB, C)
        off += k * CHANNEL_OUT

    feat = jnp.concatenate(pooled, axis=1)                   # (TB, 40)
    feat = jnp.maximum(feat + bias_all_ref[...], 0.0)        # bias + ReLU

    # TODO(synk): nn.Dropout treated as identity (inference-mode forward).
    h = jnp.dot(feat, lin1_w_ref[...],
                preferred_element_type=jnp.float32) + lin1_b_ref[...]
    h = jnp.maximum(h, 0.0)                                  # (TB, 10)

    # Final (10 -> 1) head on the VPU: broadcast-mul + lane reduction.
    out = jnp.sum(h * lin2_w_ref[...], axis=-1, keepdims=True) + lin2_b_ref[...]

    # Lane-dense store: broadcast the scalar column across all 128 lanes.
    out_ref[...] = jnp.broadcast_to(out, out_ref.shape)


def _pick_batch_tile(batch, seq, emb):
    """Size the batch tile for a ~16 MiB VMEM budget (fits v5e/v6e/v7x)."""
    budget = 16 * 1024 * 1024
    # 2x double-buffered bf16 embed block + f32 fused conv intermediate + slack.
    per_row = seq * (2 * 2 * emb + 4 * N_FUSED) + 4 * 256
    tb = max(8, budget // max(per_row, 1))
    tb = int(min(tb, 256))
    if batch <= tb:
        return batch              # single block: block dims == array dims
    return (tb // 8) * 8          # multi-block: keep sublane dim 8-aligned


def cnnreg_forward(x_tokens, params):
    B, S = x_tokens.shape
    if S < max(KERNEL_SIZES):
        raise ValueError(f"sequence length {S} must be >= {max(KERNEL_SIZES)}")
    E = params['embedding'].shape[1]

    # TODO(synk): embedding gather stays in JAX glue (one extra HBM round trip
    # for the activation); fully fusing it needs an in-kernel DMA gather with
    # scalar-prefetched token ids + a memory_space=pl.ANY embedding table.
    embed = params['embedding'][x_tokens].astype(jnp.bfloat16)     # (B, S, E)

    # Pack all conv taps into one (E, 140) lane-dense RHS; concat biases.
    w_parts, b_parts = [], []
    for k in KERNEL_SIZES:
        w = params[f'conv{k}_w']                                   # (k, E, C)
        w_parts.append(jnp.transpose(w, (1, 0, 2)).reshape(E, k * CHANNEL_OUT))
        b_parts.append(params[f'conv{k}_b'].reshape(1, CHANNEL_OUT))
    w_all = jnp.concatenate(w_parts, axis=1).astype(jnp.bfloat16)  # (E, 140)
    bias_all = jnp.concatenate(b_parts, axis=1)                    # (1, 40) f32
    lin1_w = params['lin1_w']                                      # (40, 10)
    lin1_b = params['lin1_b'].reshape(1, 10)
    lin2_w = params['lin2_w'].reshape(1, 10)                       # row vec for VPU head
    lin2_b = params['lin2_b'].reshape(1, 1)

    TB = _pick_batch_tile(B, S, E)
    Bp = ((B + TB - 1) // TB) * TB
    if Bp != B:
        embed = jnp.pad(embed, ((0, Bp - B), (0, 0), (0, 0)))
    grid = (Bp // TB,)

    in_specs = [
        pl.BlockSpec((TB, S, E), lambda b: (b, 0, 0)),      # pipelined activation
        pl.BlockSpec((E, N_FUSED), lambda b: (0, 0)),       # resident weights
        pl.BlockSpec((1, N_FEAT), lambda b: (0, 0)),
        pl.BlockSpec((N_FEAT, 10), lambda b: (0, 0)),
        pl.BlockSpec((1, 10), lambda b: (0, 0)),
        pl.BlockSpec((1, 10), lambda b: (0, 0)),
        pl.BlockSpec((1, 1), lambda b: (0, 0)),
    ]
    out_specs = pl.BlockSpec((TB, 128), lambda b: (b, 0))   # lane-dense output

    flops = 2 * Bp * S * E * N_FUSED + 2 * Bp * N_FEAT * 10 + 2 * Bp * 10
    bytes_accessed = (Bp * S * E * 2 + E * N_FUSED * 2
                      + 4 * (N_FEAT + N_FEAT * 10 + 10 + 10 + 1)
                      + Bp * 128 * 4)

    out_padded = pl.pallas_call(
        cnnreg_kernel,
        out_shape=jax.ShapeDtypeStruct((Bp, 128), jnp.float32),
        grid_spec=pltpu.PrefetchScalarGridSpec(
            num_scalar_prefetch=0,
            grid=grid,
            in_specs=in_specs,
            out_specs=out_specs),
        compiler_params=pltpu.CompilerParams(
            dimension_semantics=("parallel",)),
        cost_estimate=pl.CostEstimate(
            flops=flops, transcendentals=0, bytes_accessed=bytes_accessed),
    )(embed, w_all, bias_all, lin1_w, lin1_b, lin2_w, lin2_b)

    return out_padded[:B, :1]


def init_params(key, voca_num, embedding_dim):
    keys = jax.random.split(key, 16)
    p = {}
    p['embedding'] = jax.random.normal(keys[0], (voca_num, embedding_dim),
                                       jnp.float32)
    for idx, k in enumerate(KERNEL_SIZES):
        p[f'conv{k}_w'] = 0.1 * jax.random.normal(
            keys[1 + idx], (k, embedding_dim, CHANNEL_OUT), jnp.float32)
        p[f'conv{k}_b'] = 0.1 * jax.random.normal(
            keys[5 + idx], (1, CHANNEL_OUT), jnp.float32)
    p['lin1_w'] = 0.1 * jax.random.normal(
        keys[9], (CHANNEL_OUT * len(KERNEL_SIZES), 10), jnp.float32)
    p['lin1_b'] = 0.1 * jax.random.normal(keys[10], (1, 10), jnp.float32)
    p['lin2_w'] = 0.1 * jax.random.normal(keys[11], (10, 1), jnp.float32)
    p['lin2_b'] = 0.1 * jax.random.normal(keys[12], (1, 1), jnp.float32)
    return p


def cnnreg_reference(x_tokens, params):
    """Pure-JAX f32 reference mirroring the PyTorch forward (dropout = identity)."""
    embed = params['embedding'][x_tokens].astype(jnp.float32)
    S = embed.shape[1]
    feats = []
    for k in KERNEL_SIZES:
        w, b = params[f'conv{k}_w'], params[f'conv{k}_b']
        L = S - k + 1
        acc = sum(jnp.einsum('ble,ec->blc', embed[:, i:i + L, :], w[i])
                  for i in range(k))
        acc = jax.nn.relu(acc + b.reshape(1, 1, -1))
        feats.append(jnp.max(acc, axis=1))
    feat = jnp.concatenate(feats, axis=1)
    h = jax.nn.relu(feat @ params['lin1_w'] + params['lin1_b'])
    return h @ params['lin2_w'] + params['lin2_b']


if __name__ == "__main__":
    key = jax.random.PRNGKey(0)
    k_params, k_tokens = jax.random.split(key)

    voca_num, embedding_dim = 50, 32
    B, S = 2, 8

    params = init_params(k_params, voca_num, embedding_dim)
    x = jax.random.randint(k_tokens, (B, S), 0, voca_num, dtype=jnp.int32)

    out = cnnreg_forward(x, params)
    jax.block_until_ready(out)

    ref = cnnreg_reference(x, params)
    assert out.shape == (B, 1), out.shape
    # bf16 matmul inputs (f32 accumulate) -> compare against f32 reference
    # with a bf16-appropriate tolerance.
    assert jnp.allclose(out, ref, atol=2e-2, rtol=2e-2), (out, ref)

    print("KERNEL_OK")
</pallas_src>

<mosaic_0001>
module attributes {stable_mosaic.version = 11 : i64} {
  func.func @cnnreg_kernel(%arg0: i32, %arg1: memref<2x8x32xbf16, #tpu.memory_space<vmem>>, %arg2: memref<32x140xbf16, #tpu.memory_space<vmem>>, %arg3: memref<1x40xf32, #tpu.memory_space<vmem>>, %arg4: memref<40x10xf32, #tpu.memory_space<vmem>>, %arg5: memref<1x10xf32, #tpu.memory_space<vmem>>, %arg6: memref<1x10xf32, #tpu.memory_space<vmem>>, %arg7: memref<1x1xf32, #tpu.memory_space<vmem>>, %arg8: memref<2x128xf32, #tpu.memory_space<vmem>>) attributes {dimension_semantics = [#tpu.dimension_semantics<parallel>], iteration_bounds = array<i64: 1>, scalar_prefetch = 0 : i64, scratch_operands = 0 : i64, tpu.core_type = #tpu.core_type<tc>, window_params = [{transform_indices = @transform_0, window_bounds = array<i64: 2, 8, 32>}, {pipeline_mode = #tpu.pipeline_mode<synchronous>, transform_indices = @transform_1, window_bounds = array<i64: 32, 140>}, {pipeline_mode = #tpu.pipeline_mode<synchronous>, transform_indices = @transform_2, window_bounds = array<i64: 1, 40>}, {pipeline_mode = #tpu.pipeline_mode<synchronous>, transform_indices = @transform_3, window_bounds = array<i64: 40, 10>}, {pipeline_mode = #tpu.pipeline_mode<synchronous>, transform_indices = @transform_4, window_bounds = array<i64: 1, 10>}, {pipeline_mode = #tpu.pipeline_mode<synchronous>, transform_indices = @transform_5, window_bounds = array<i64: 1, 10>}, {pipeline_mode = #tpu.pipeline_mode<synchronous>, transform_indices = @transform_6, window_bounds = array<i64: 1, 1>}, {transform_indices = @transform_7, window_bounds = array<i64: 2, 128>}]} {
    %c0 = arith.constant 0 : index
    %c0_0 = arith.constant 0 : index
    %c0_1 = arith.constant 0 : index
    %0 = vector.load %arg1[%c0, %c0_0, %c0_1] : memref<2x8x32xbf16, #tpu.memory_space<vmem>>, vector<2x8x32xbf16>
    %c0_2 = arith.constant 0 : index
    %c0_3 = arith.constant 0 : index
    %1 = vector.load %arg2[%c0_2, %c0_3] : memref<32x140xbf16, #tpu.memory_space<vmem>>, vector<32x140xbf16>
    "tpu.trace_start"() <{level = 10 : i32, message = "bse,ec->bsc"}> : () -> ()
    %cst = arith.constant dense<0.000000e+00> : vector<2x8x140xf32>
    %2 = tpu.matmul %0, %1, %cst {dimension_numbers = #tpu.dot_dimension_numbers<[2], [0], [0, 1], [1], [0, 0, 0, 1, 1, 1], [], []>} : vector<2x8x32xbf16>, vector<32x140xbf16>, vector<2x8x140xf32> -> vector<2x8x140xf32>
    "tpu.trace_stop"() : () -> ()
    %3 = vector.extract_strided_slice %2 {offsets = [0, 0, 0], sizes = [2, 7, 10], strides = [1, 1, 1]} : vector<2x8x140xf32> to vector<2x7x10xf32>
    %4 = vector.extract_strided_slice %2 {offsets = [0, 1, 10], sizes = [2, 7, 10], strides = [1, 1, 1]} : vector<2x8x140xf32> to vector<2x7x10xf32>
    %5 = arith.addf %3, %4 : vector<2x7x10xf32>
    %cst_4 = arith.constant dense<0xFF800000> : vector<2x10xf32>
    %6 = vector.multi_reduction <maximumf>, %5, %cst_4 [1] : vector<2x7x10xf32> to vector<2x10xf32>
    %7 = vector.extract_strided_slice %2 {offsets = [0, 0, 20], sizes = [2, 6, 10], strides = [1, 1, 1]} : vector<2x8x140xf32> to vector<2x6x10xf32>
    %8 = vector.extract_strided_slice %2 {offsets = [0, 1, 30], sizes = [2, 6, 10], strides = [1, 1, 1]} : vector<2x8x140xf32> to vector<2x6x10xf32>
    %9 = arith.addf %7, %8 : vector<2x6x10xf32>
    %10 = vector.extract_strided_slice %2 {offsets = [0, 2, 40], sizes = [2, 6, 10], strides = [1, 1, 1]} : vector<2x8x140xf32> to vector<2x6x10xf32>
    %11 = arith.addf %9, %10 : vector<2x6x10xf32>
    %cst_5 = arith.constant dense<0xFF800000> : vector<2x10xf32>
    %12 = vector.multi_reduction <maximumf>, %11, %cst_5 [1] : vector<2x6x10xf32> to vector<2x10xf32>
    %13 = vector.extract_strided_slice %2 {offsets = [0, 0, 50], sizes = [2, 5, 10], strides = [1, 1, 1]} : vector<2x8x140xf32> to vector<2x5x10xf32>
    %14 = vector.extract_strided_slice %2 {offsets = [0, 1, 60], sizes = [2, 5, 10], strides = [1, 1, 1]} : vector<2x8x140xf32> to vector<2x5x10xf32>
    %15 = arith.addf %13, %14 : vector<2x5x10xf32>
    %16 = vector.extract_strided_slice %2 {offsets = [0, 2, 70], sizes = [2, 5, 10], strides = [1, 1, 1]} : vector<2x8x140xf32> to vector<2x5x10xf32>
    %17 = arith.addf %15, %16 : vector<2x5x10xf32>
    %18 = vector.extract_strided_slice %2 {offsets = [0, 3, 80], sizes = [2, 5, 10], strides = [1, 1, 1]} : vector<2x8x140xf32> to vector<2x5x10xf32>
    %19 = arith.addf %17, %18 : vector<2x5x10xf32>
    %cst_6 = arith.constant dense<0xFF800000> : vector<2x10xf32>
    %20 = vector.multi_reduction <maximumf>, %19, %cst_6 [1] : vector<2x5x10xf32> to vector<2x10xf32>
    %21 = vector.extract_strided_slice %2 {offsets = [0, 0, 90], sizes = [2, 4, 10], strides = [1, 1, 1]} : vector<2x8x140xf32> to vector<2x4x10xf32>
    %22 = vector.extract_strided_slice %2 {offsets = [0, 1, 100], sizes = [2, 4, 10], strides = [1, 1, 1]} : vector<2x8x140xf32> to vector<2x4x10xf32>
    %23 = arith.addf %21, %22 : vector<2x4x10xf32>
    %24 = vector.extract_strided_slice %2 {offsets = [0, 2, 110], sizes = [2, 4, 10], strides = [1, 1, 1]} : vector<2x8x140xf32> to vector<2x4x10xf32>
    %25 = arith.addf %23, %24 : vector<2x4x10xf32>
    %26 = vector.extract_strided_slice %2 {offsets = [0, 3, 120], sizes = [2, 4, 10], strides = [1, 1, 1]} : vector<2x8x140xf32> to vector<2x4x10xf32>
    %27 = arith.addf %25, %26 : vector<2x4x10xf32>
    %28 = vector.extract_strided_slice %2 {offsets = [0, 4, 130], sizes = [2, 4, 10], strides = [1, 1, 1]} : vector<2x8x140xf32> to vector<2x4x10xf32>
    %29 = arith.addf %27, %28 : vector<2x4x10xf32>
    %cst_7 = arith.constant dense<0xFF800000> : vector<2x10xf32>
    %30 = vector.multi_reduction <maximumf>, %29, %cst_7 [1] : vector<2x4x10xf32> to vector<2x10xf32>
    %31 = tpu.concatenate %6, %12, %20, %30 in 1 : vector<2x10xf32>, vector<2x10xf32>, vector<2x10xf32>, vector<2x10xf32> -> vector<2x40xf32>
    %c0_8 = arith.constant 0 : index
    %c0_9 = arith.constant 0 : index
    %32 = vector.load %arg3[%c0_8, %c0_9] : memref<1x40xf32, #tpu.memory_space<vmem>>, vector<1x40xf32>
    %33 = vector.broadcast %32 : vector<1x40xf32> to vector<2x40xf32>
    %34 = arith.addf %31, %33 : vector<2x40xf32>
    %cst_10 = arith.constant 0.000000e+00 : f32
    %35 = vector.broadcast %cst_10 : f32 to vector<2x40xf32>
    %36 = arith.maximumf %34, %35 : vector<2x40xf32>
    %c0_11 = arith.constant 0 : index
    %c0_12 = arith.constant 0 : index
    %37 = vector.load %arg4[%c0_11, %c0_12] : memref<40x10xf32, #tpu.memory_space<vmem>>, vector<40x10xf32>
    %cst_13 = arith.constant dense<0.000000e+00> : vector<2x10xf32>
    %38 = tpu.matmul %36, %37, %cst_13 {dimension_numbers = #tpu.dot_dimension_numbers<[1], [0], [0], [1], [0, 0, 1, 1], [], []>} : vector<2x40xf32>, vector<40x10xf32>, vector<2x10xf32> -> vector<2x10xf32>
    %c0_14 = arith.constant 0 : index
    %c0_15 = arith.constant 0 : index
    %39 = vector.load %arg5[%c0_14, %c0_15] : memref<1x10xf32, #tpu.memory_space<vmem>>, vector<1x10xf32>
    %40 = vector.broadcast %39 : vector<1x10xf32> to vector<2x10xf32>
    %41 = arith.addf %38, %40 : vector<2x10xf32>
    %cst_16 = arith.constant 0.000000e+00 : f32
    %42 = vector.broadcast %cst_16 : f32 to vector<2x10xf32>
    %43 = arith.maximumf %41, %42 : vector<2x10xf32>
    %c0_17 = arith.constant 0 : index
    %c0_18 = arith.constant 0 : index
    %44 = vector.load %arg6[%c0_17, %c0_18] : memref<1x10xf32, #tpu.memory_space<vmem>>, vector<1x10xf32>
    %45 = vector.broadcast %44 : vector<1x10xf32> to vector<2x10xf32>
    %46 = arith.mulf %43, %45 : vector<2x10xf32>
    %cst_19 = arith.constant dense<0.000000e+00> : vector<2xf32>
    %47 = vector.multi_reduction <add>, %46, %cst_19 [1] : vector<2x10xf32> to vector<2xf32>
    %48 = vector.shape_cast %47 : vector<2xf32> to vector<2x1xf32>
    %c0_20 = arith.constant 0 : index
    %c0_21 = arith.constant 0 : index
    %49 = vector.load %arg7[%c0_20, %c0_21] : memref<1x1xf32, #tpu.memory_space<vmem>>, vector<1x1xf32>
    %50 = vector.broadcast %49 : vector<1x1xf32> to vector<2x1xf32>
    %51 = arith.addf %48, %50 : vector<2x1xf32>
    %52 = vector.shape_cast %51 : vector<2x1xf32> to vector<2x1xf32>
    %53 = vector.broadcast %52 : vector<2x1xf32> to vector<2x128xf32>
    %c0_22 = arith.constant 0 : index
    %c0_23 = arith.constant 0 : index
    %54 = vector.load %arg8[%c0_22, %c0_23] : memref<2x128xf32, #tpu.memory_space<vmem>>, vector<2x128xf32>
    tpu.vector_store %arg8[%c0_22, %c0_23], %53 {strides = array<i32>} : memref<2x128xf32, #tpu.memory_space<vmem>>, vector<2x128xf32>,
    return
  }
  func.func @transform_0(%arg0: i32) -> (i32, i32, i32) {
    %c0_i32 = arith.constant 0 : i32
    %c0_i32_0 = arith.constant 0 : i32
    %c0_i32_1 = arith.constant 0 : i32
    return %arg0, %c0_i32, %c0_i32_0 : i32, i32, i32
  }
  func.func @transform_1(%arg0: i32) -> (i32, i32) {
    %c0_i32 = arith.constant 0 : i32
    %c0_i32_0 = arith.constant 0 : i32
    %c0_i32_1 = arith.constant 0 : i32
    return %c0_i32, %c0_i32_0 : i32, i32
  }
  func.func @transform_2(%arg0: i32) -> (i32, i32) {
    %c0_i32 = arith.constant 0 : i32
    %c0_i32_0 = arith.constant 0 : i32
    %c0_i32_1 = arith.constant 0 : i32
    return %c0_i32, %c0_i32_0 : i32, i32
  }
  func.func @transform_3(%arg0: i32) -> (i32, i32) {
    %c0_i32 = arith.constant 0 : i32
    %c0_i32_0 = arith.constant 0 : i32
    %c0_i32_1 = arith.constant 0 : i32
    return %c0_i32, %c0_i32_0 : i32, i32
  }
  func.func @transform_4(%arg0: i32) -> (i32, i32) {
    %c0_i32 = arith.constant 0 : i32
    %c0_i32_0 = arith.constant 0 : i32
    %c0_i32_1 = arith.constant 0 : i32
    return %c0_i32, %c0_i32_0 : i32, i32
  }
  func.func @transform_5(%arg0: i32) -> (i32, i32) {
    %c0_i32 = arith.constant 0 : i32
    %c0_i32_0 = arith.constant 0 : i32
    %c0_i32_1 = arith.constant 0 : i32
    return %c0_i32, %c0_i32_0 : i32, i32
  }
  func.func @transform_6(%arg0: i32) -> (i32, i32) {
    %c0_i32 = arith.constant 0 : i32
    %c0_i32_0 = arith.constant 0 : i32
    %c0_i32_1 = arith.constant 0 : i32
    return %c0_i32, %c0_i32_0 : i32, i32
  }
  func.func @transform_7(%arg0: i32) -> (i32, i32) {
    %c0_i32 = arith.constant 0 : i32
    %c0_i32_0 = arith.constant 0 : i32
    return %arg0, %c0_i32 : i32, i32
  }
}

</mosaic_0001>

<bundles_post_ra>
// kernel: tpu_custom_call.1
= control target key start
LH: loop header
LB: loop body
LE: loop exit
PB: predicated region body
PF: predicated region fallthrough
CT: control target
= control target key end

     0   :  { %s508_s0 = inlined_call_operand.vmem [shape: bf16[2,8,32], index: 0, kind: input, shape index: {}]   ;;  %s509_s1 = inlined_call_operand.vmem [shape: bf16[32,140], index: 1, kind: input, shape index: {}]   ;;  %s510_s2 = inlined_call_operand.vmem [shape: f32[1,40], index: 2, kind: input, shape index: {}]   ;;  %s511_s3 = inlined_call_operand.vmem [shape: f32[40,10], index: 3, kind: input, shape index: {}]   ;;  %s512_s4 = inlined_call_operand.vmem [shape: f32[1,10], index: 4, kind: input, shape index: {}]   ;;  %s513_s5 = inlined_call_operand.vmem [shape: f32[1,10], index: 5, kind: input, shape index: {}]   ;;  %s514_s6 = inlined_call_operand.<no memory space> [shape: f32[1,1], index: 6, kind: input, shape index: {}]   ;;  %s515_s7 = inlined_call_operand.hbm [shape: f32[2,128], index: 7, kind: output, shape index: {}]  }
   0x1   :  { %v12_v0 = vstv %s514_s6 }
   0x2   :  { %13 = vst [vmem:[#allocation2] sm:$0x1] %v12_v0 }
   0x3   :  { %v329_v1 = vld [vmem:[%s509_s1 + $0x10] sm:$0xf]  ;;  %v342_v2 = vld [vmem:[%s509_s1 + $0x14] sm:$0xf0]  ;;  %v341_v3 = vld [vmem:[%s509_s1 + $0x14] sm:$0xf] }
   0x4   :  { %v330_v4 = vor.u32 %v342_v2, %v329_v1  ;;  %v331_v5 = vld [vmem:[%s509_s1 + $0x18] sm:$0xf0]  ;;  %v321_v6 = vld [vmem:[%s509_s1] sm:$0xf]  ;;  %v340_v7 = vld [vmem:[%s509_s1 + $0x4] sm:$0xf0] }
   0x5   :  { %v334_v8 = vor.u32 %v341_v3, %v331_v5  ;;  %v339_v9 = vld [vmem:[%s509_s1 + $0x4] sm:$0xf]  ;;  %v323_v10 = vld [vmem:[%s509_s1 + $0x8] sm:$0xf0]  ;;  %v322_v11 = vor.u32 %v340_v7, %v321_v6 }
   0x6   :  { %71 = vmatpush.bf16.msra.mxu0 %v330_v4  ;;  %v326_v12 = vor.u32 %v339_v9, %v323_v10 }
   0x7   :  { %85 = vmatpush.bf16.msra.mxu1 %v334_v8 }
   0x8   :  { %14 = vsyncpa [#allocation4], 0  ;;  %v338_v13 = vld [vmem:[%s508_s0] sm:$0xff]  ;;  %vm61_vm0 = vcmask 261120   ;;  %s382_s20 = smov 98   ;;  %s383_s1 = smov 108  }
   0x9   :  { %s384_s21 = smov 118   ;;  %s385_s0 = smov 88   ;;  %vm105_vm1 = vcmask 79872   ;;  %vm130_vm2 = vcmask 242848   ;;  %vm178_vm3 = vcmask 801792   ;;  %vm155_vm4 = vcmask 487824  }
   0xa   :  { %72 = vmatpush.bf16.msra.mxu0 %v322_v11  ;;  %vm195_vm5 = vcmask 814800   ;;  %vm212_vm6 = vcmask 1041409   ;;  %s386_s22 = smov 68   ;;  %vm233_vm7 = vcmask 80896   ;;  %vm235_vm8 = vcmask 162816   ;;  %s306_s16 = sshll.u32 %s515_s7, 4  ;;  %s307_s16 = int_to_ptr.hbm [resolvable:$true] %s306_s16 }
   0xb   :  { %86 = vmatpush.bf16.msra.mxu1 %v326_v12  ;;  %vm237_vm9 = vcmask 244736   ;;  %vm254_vm10 = vcmask 326656   ;;  %vm284_vm11 = vcmask 74752  }
   0xd   :  { %335 = vmatmul.msk.bf16.vlgmr.msra.gmra.mxu0 %vm61_vm0, %v338_v13 }
   0xe   :  { %336 = vmatmul.msk.bf16.vlgmr.msra.gmra.mxu1 %vm61_vm0, %v338_v13 }
  0x8a   :  { %v74_v14 = vpop.f32.mrf.mxu0 }
  0x8b   :  { %v145_v15 = vrot.slane %v74_v14, 3  ;;  %v120_v16 = vrot.slane %v74_v14, 2  ;;  %v95_v17 = vrot.slane %v74_v14, 1  ;;  %v88_v18 = vpop.f32.mrf.mxu1 }
  0x8c   :  { %v172_v19 = vrot.slane %v88_v18, 3  ;;  %v185_v24 = vrot.slane %v88_v18, 4 }
  0x8d   :  { %147 = vrot.lane.b32.xlu2 %v145_v15, %s382_s20  ;;  %122 = vrot.lane.b32.xlu1 %v120_v16, %s383_s1 }
  0x8e   :  { %97 = vrot.lane.b32.xlu0 %v95_v17, %s384_s21 }
  0x92   :  { %v76_v20 = vpop.f32.mrf.mxu0 }
  0x93   :  { %v121_v21 = vrot.slane %v76_v20, 2  ;;  %v146_v22 = vrot.slane %v76_v20, 3  ;;  %v90_v23 = vpop.f32.mrf.mxu1  ;;  %v96_v26 = vrot.slane %v76_v20, 1 }
  0x94   :  { %v173_v25 = vrot.slane %v90_v23, 3  ;;  %v186_v27 = vrot.slane %v90_v23, 4 }
  0x95   :  { %149 = vrot.lane.b32.xlu2 %v146_v22, %s382_s20  ;;  %124 = vrot.lane.b32.xlu1 %v121_v21, %s383_s1 }
  0x96   :  { %174 = vrot.lane.b32.xlu0 %v172_v19, %s382_s20 }
  0x9d   :  { %187 = vrot.lane.b32.xlu2 %v185_v24, %s385_s0  ;;  %176 = vrot.lane.b32.xlu1 %v173_v25, %s382_s20 }
  0x9e   :  { %99 = vrot.lane.b32.xlu0 %v96_v26, %s384_s21 }
  0xa6   :  { %189 = vrot.lane.b32.xlu0 %v186_v27, %s385_s0 }
  0xe7   :  { %v148_v28 = vpop.permute.xlu2 %147 }
  0xef   :  { %v150_v31 = vpop.permute.xlu2 %149 }
  0xf7   :  { %v188_v43 = vpop.permute.xlu2 %187 }
  0xff   :  { %v123_v29 = vpop.permute.xlu1 %122 }
 0x100   :  { %v98_v30 = vpop.permute.xlu0 %97 }
 0x101   :  { %v103_v32 = vadd.f32 %v98_v30, %v74_v14 }
 0x103   :  { %v128_v33 = vadd.f32 %v123_v29, %v103_v32  ;;  %v106_v34 = vsel %vm105_vm1, %v103_v32, -inf }
 0x104   :  { %v107_v36 = vrot.slane %v106_v34, 4 }
 0x105   :  { %v153_v35 = vadd.f32 %v148_v28, %v128_v33  ;;  %v131_v37 = vsel %vm130_vm2, %v128_v33, -inf }
 0x106   :  { %v132_v44 = vrot.slane %v131_v37, 4  ;;  %v108_v45 = vmax.f32 %v106_v34, %v107_v36 }
 0x107   :  { %v125_v40 = vpop.permute.xlu1 %124  ;;  %v156_v41 = vsel %vm155_vm4, %v153_v35, -inf }
 0x108   :  { %v175_v38 = vpop.permute.xlu0 %174  ;;  %v157_v47 = vrot.slane %v156_v41, 4  ;;  %v133_v49 = vmax.f32 %v131_v37, %v132_v44  ;;  %v109_v50 = vrot.slane %v108_v45, 2 }
 0x109   :  { %v179_v39 = vsel %vm178_vm3, %v148_v28, %v175_v38 }
 0x10a   :  { %v183_v42 = vadd.f32 %v179_v39, %v128_v33  ;;  %v158_v52 = vmax.f32 %v156_v41, %v157_v47  ;;  %v134_v55 = vrot.slane %v133_v49, 2  ;;  %v110_v59 = vmax.f32 %v108_v45, %v109_v50  ;;  %v248_v47 = vld [vmem:[%s511_s3 + $0x18] sm:$0xff]  ;;  %v245_v50 = vld [vmem:[%s511_s3] sm:$0xff] }
 0x10c   :  { %v193_v46 = vadd.f32 %v188_v43, %v183_v42  ;;  %v159_v0 = vrot.slane %v158_v52, 2  ;;  %v135_v6 = vmax.f32 %v133_v49, %v134_v55  ;;  %v111_v11 = vrot.slane %v110_v59, 1  ;;  %v246_v49 = vld [vmem:[%s511_s3 + $0x8] sm:$0xff] }
 0x10e   :  { %v196_v48 = vsel %vm195_vm5, %v193_v46, -inf  ;;  %v160_v14 = vmax.f32 %v158_v52, %v159_v0  ;;  %v136_v19 = vrot.slane %v135_v6, 1  ;;  %v112_v24 = vmax.f32 %v110_v59, %v111_v11  ;;  %v249_v46 = vld [vmem:[%s511_s3 + $0x20] sm:$0xff] }
 0x10f   :  { %v197_v54 = vrot.slane %v196_v48, 4  ;;  %v177_v56 = vpop.permute.xlu1 %176  ;;  %269 = vmatpush.msra.mxu2 %v249_v46 }
 0x110   :  { %v100_v51 = vpop.permute.xlu0 %99  ;;  %v180_v1 = vsel %vm178_vm3, %v150_v31, %v177_v56  ;;  %v161_v26 = vrot.slane %v160_v14, 1 }
 0x111   :  { %v104_v53 = vadd.f32 %v100_v51, %v76_v20  ;;  %v198_v63 = vmax.f32 %v196_v48, %v197_v54  ;;  %270 = vmatpush.msra.mxu2 %v248_v47  ;;  %v247_v48 = vld [vmem:[%s511_s3 + $0x10] sm:$0xff] }
 0x112   :  { %v162_v36 = vmax.f32 %v160_v14, %v161_v26 }
 0x113   :  { %v113_v57 = vsel %vm105_vm1, %v104_v53, -inf  ;;  %v129_v58 = vadd.f32 %v125_v40, %v104_v53  ;;  %v199_v12 = vrot.slane %v198_v63, 2  ;;  %271 = vmatpush.msra.mxu2 %v247_v48  ;;  %v352_v53 = vld [vmem:[%s510_s2] ss:$0 sm:$0xff]  ;;  %s388_s2 = smov [#allocation3]  }
 0x114   :  { %v114_v60 = vrot.slane %v113_v57, 4 }
 0x115   :  { %v138_v61 = vsel %vm130_vm2, %v129_v58, -inf  ;;  %v154_v62 = vadd.f32 %v150_v31, %v129_v58  ;;  %v184_v5 = vadd.f32 %v180_v1, %v129_v58  ;;  %v200_v25 = vmax.f32 %v198_v63, %v199_v12  ;;  %272 = vmatpush.msra.mxu2 %v246_v49  ;;  %v354_v63 = vld [vmem:[%s513_s5] ss:$0 sm:$0xff] }
 0x116   :  { %v115_v2 = vmax.f32 %v113_v57, %v114_v60  ;;  %v139_v3 = vrot.slane %v138_v61, 4  ;;  %v137_v31 = vmax.f32 %v135_v6, %v136_v19  ;;  %v353_v60 = vld [vmem:[%s512_s4] ss:$0 sm:$0xff]  ;;  %s304_s4 = sshll.u32 %s388_s2, 4  ;;  %s305_s4 = int_to_ptr.vmem [resolvable:$true] %s304_s4 }
 0x117   :  { %v163_v4 = vsel %vm155_vm4, %v154_v62, -inf  ;;  %v201_v40 = vrot.slane %v200_v25, 1  ;;  %273 = vmatpush.msra.mxu2 %v245_v50 }
 0x118   :  { %v116_v7 = vrot.slane %v115_v2, 2  ;;  %v140_v8 = vmax.f32 %v138_v61, %v139_v3  ;;  %v164_v9 = vrot.slane %v163_v4, 4  ;;  %v190_v10 = vpop.permute.xlu0 %189  ;;  %v387_v3 = vmov 0  }
 0x119   :  { %v194_v13 = vadd.f32 %v190_v10, %v184_v5  ;;  %v202_v43 = vmax.f32 %v200_v25, %v201_v40  ;;  %350 = vset.pattern.permute.xlu2 %v387_v3  ;;  %351 = vset.pattern.permute.xlu0 %v387_v3 }
 0x11a   :  { %v117_v15 = vmax.f32 %v115_v2, %v116_v7  ;;  %v141_v16 = vrot.slane %v140_v8, 2  ;;  %v165_v17 = vmax.f32 %v163_v4, %v164_v9  ;;  %v355_v4 = vld [vmem:[#allocation2] ss:$0 sm:$0xff] }
 0x11b   :  { %v203_v18 = vsel %vm195_vm5, %v194_v13, -inf }
 0x11c   :  { %v118_v20 = vrot.slane %v117_v15, 1  ;;  %v204_v21 = vrot.slane %v203_v18, 4  ;;  %v142_v22 = vmax.f32 %v140_v8, %v141_v16  ;;  %v166_v23 = vrot.slane %v165_v17, 2 }
 0x11e   :  { %v119_v27 = vmax.f32 %v117_v15, %v118_v20  ;;  %v205_v28 = vmax.f32 %v203_v18, %v204_v21  ;;  %v143_v29 = vrot.slane %v142_v22, 1  ;;  %v167_v30 = vmax.f32 %v165_v17, %v166_v23 }
 0x120   :  { %v206_v32 = vrot.slane %v205_v28, 2  ;;  %v144_v33 = vmax.f32 %v142_v22, %v143_v29  ;;  %v168_v34 = vrot.slane %v167_v30, 1  ;;  %v213_v35 = vsel %vm212_vm6, %v119_v27, %v112_v24 }
 0x122   :  { %v207_v37 = vmax.f32 %v205_v28, %v206_v32  ;;  %v217_v38 = vsel %vm212_vm6, %v144_v33, %v137_v31  ;;  %v169_v39 = vmax.f32 %v167_v30, %v168_v34 }
 0x123   :  { %218 = vrot.lane.b32.xlu1 %v217_v38, %s384_s21 }
 0x124   :  { %v208_v41 = vrot.slane %v207_v37, 1  ;;  %v223_v42 = vsel %vm212_vm6, %v169_v39, %v162_v36 }
 0x125   :  { %224 = vrot.lane.b32.xlu2 %v223_v42, %s382_s20 }
 0x126   :  { %v209_v44 = vmax.f32 %v207_v37, %v208_v41 }
 0x128   :  { %v229_v45 = vsel %vm212_vm6, %v209_v44, %v202_v43 }
 0x129   :  { %230 = vrot.lane.b32.xlu0 %v229_v45, %s386_s22 }
 0x17f   :  { %v225_v54 = vpop.permute.xlu2 %224 }
 0x195   :  { %v219_v51 = vpop.permute.xlu1 %218 }
 0x196   :  { %v234_v52 = vsel %vm233_vm7, %v213_v35, %v219_v51 }
 0x197   :  { %v236_v55 = vsel %vm235_vm8, %v234_v52, %v225_v54 }
 0x19b   :  { %v231_v56 = vpop.permute.xlu0 %230 }
 0x19c   :  { %v238_v57 = vsel %vm237_vm9, %v236_v55, %v231_v56 }
 0x19d   :  { %v243_v58 = vadd.f32 %v352_v53, %v238_v57 }
 0x19f   :  { %v244_v59 = vmax.f32 %v243_v58, 0.0 }
 0x1a1   :  { %337 = vmatmul.msk.f32.vlgmr.msra.gmra.mxu2 %vm254_vm10, %v244_v59 }
 0x224   :  { %v275_v61 = vpop.f32.mrf.mxu2 }
 0x225   :  { %v276_v62 = vadd.f32 %v353_v60, %v275_v61 }
 0x227   :  { %v278_v0 = vmax.f32 %v276_v62, 0.0 }
 0x229   :  { %v283_v1 = vmul.f32 %v354_v63, %v278_v0 }
 0x22b   :  { %v285_v2 = vsel %vm284_vm11, %v283_v1, 0.0 }
 0x22c   :  { %286 = vadd.xlane.f32.xlu1 %v285_v2 }
 0x29f   :  { %v287_v5 = vpop.xlane.xlu1 %286 }
 0x2a0   :  { %v292_v6 = vadd.f32 %v355_v4, %v287_v5 }
 0x2a2   :  { %295 = vperm.xlu2 %350, %v292_v6  }
 0x2fc   :  { %v296_v7 = vpop.permute.xlu2 %295 }
 0x2fd   :  { %298 = vst [vmem:[#allocation3] sm:$0x3] %v296_v7 }
 0x2fe   :  { %309 = dma.vmem_to_hbm [thread:$0]  %s305_s4, 32, %s307_s16, [#allocation4]  }
 0x2ff   :  { %380 = dma.done.wait [#allocation4], 32  }
 0x300   :  { %381 = vsyncadd [#allocation4], 4294967264 }
 0x301   :  { %314 = vsyncpa [#allocation4], 1 }

</bundles_post_ra>
